<compile_context>
chip_gen: v5e
topology: v5e:2x2
jax: 0.10.0
libtpu: 0.0.40
codegen_flags: <defaults>
</compile_context>

<pallas_src>
import jax
import jax.numpy as jnp
import numpy as np
from jax.experimental import pallas as pl
from jax.experimental.pallas import tpu as pltpu

# `eps` is a module-level global in the original evaluateRiemannianBDModel.py.
EPS = 1e-7

LANE = 128                 # samples per packed row (lane width)
ROW_ELEMS = 9 * LANE       # 1152 lanes per packed row (9 matrix entries/sample)
TR_MAX = 256               # max rows per grid step  (256*128 = 32768 samples, ~2.4 MB in)
SPLIT_MIN_ROWS = 112       # only split the grid if each shard still moves >= ~1 MB


def _geodesic_kernel(r_ref, yp_ref, yt_ref, out_ref):
    """r_ref: (1152, 128) bf16 selection matrix (VMEM-resident).
    yp_ref / yt_ref: (TR, 1152) — 128 consecutive samples per row, lane-dense.
    out_ref: (TR, 128) f32 clamped cosine, one lane per sample."""
    p = yp_ref[...].astype(jnp.float32) * yt_ref[...].astype(jnp.float32)
    # bf16 hi/lo split: R is 0/1 (exact in bf16) and p_hi is exactly
    # representable, so the MXU reduction keeps ~f32 accuracy regardless of the
    # default matmul precision.  Both dots are tiny and hidden under the DMA.
    p_hi = p.astype(jnp.bfloat16)
    p_lo = (p - p_hi.astype(jnp.float32)).astype(jnp.bfloat16)
    r = r_ref[...]
    tr = (jnp.dot(p_hi, r, preferred_element_type=jnp.float32) +
          jnp.dot(p_lo, r, preferred_element_type=jnp.float32))
    # (tmp - 1)/2 clamped to the open (-1, 1) interval, like torch.clamp.
    out_ref[...] = jnp.clip((tr - 1.0) * 0.5, -1.0 + EPS, 1.0 - EPS)


def _pick_row_tile(rows):
    """Rows (of 128 samples each) per grid step."""
    if rows > TR_MAX:
        return TR_MAX                         # grid >= 2 automatically
    if rows >= 2 * SPLIT_MIN_ROWS:
        # Two steps so both v7x TensorCores get a shard; a non-full-extent tile
        # must keep the second-minor block dim a multiple of 8.
        return ((rows + 1) // 2 + 7) // 8 * 8
    return rows                               # single full-extent step


@jax.jit
def geodesic_loss_forward(ypred, ytrue):
    """ypred, ytrue: (N, 3, 3) rotation matrices -> scalar mean geodesic angle."""
    N = ypred.shape[0]
    if ypred.dtype not in (jnp.float32, jnp.bfloat16):
        ypred = ypred.astype(jnp.float32)
    if ytrue.dtype not in (jnp.float32, jnp.bfloat16):
        ytrue = ytrue.astype(jnp.float32)

    # Free reshape of the contiguous batch (no transpose, no data movement).
    yp = ypred.reshape(N, 9)
    yt = ytrue.reshape(N, 9)

    # Pad only up to the next multiple of 128 samples (<= 127 rows of 9 floats)
    # so the lane-dense (rows, 1152) view below is a free reshape.  Padded
    # samples are masked off by the [:N] slice before the mean.
    pad = (-N) % LANE
    if pad:
        yp = jnp.pad(yp, ((0, pad), (0, 0)))
        yt = jnp.pad(yt, ((0, pad), (0, 0)))
    rows = (N + pad) // LANE
    yp = yp.reshape(rows, ROW_ELEMS)
    yt = yt.reshape(rows, ROW_ELEMS)

    # Constant selection matrix: R[c, j] = 1 iff c // 9 == j, hence
    # (p @ R)[r, j] = sum_m p[r, 9*j + m] == trace for sample n = r*128 + j.
    r_sel = jnp.repeat(jnp.eye(LANE, dtype=jnp.bfloat16), 9, axis=0)

    tr_rows = _pick_row_tile(rows)
    cos_t = pl.pallas_call(
        _geodesic_kernel,
        out_shape=jax.ShapeDtypeStruct((rows, LANE), jnp.float32),
        grid=(pl.cdiv(rows, tr_rows),),
        in_specs=[
            pl.BlockSpec((ROW_ELEMS, LANE), lambda i: (0, 0)),      # R: resident
            pl.BlockSpec((tr_rows, ROW_ELEMS), lambda i: (i, 0)),
            pl.BlockSpec((tr_rows, ROW_ELEMS), lambda i: (i, 0)),
        ],
        out_specs=pl.BlockSpec((tr_rows, LANE), lambda i: (i, 0)),
        compiler_params=pltpu.CompilerParams(
            dimension_semantics=("parallel",)),
    )(r_sel, yp, yt)

    # TODO(synk): arccos has no guaranteed Mosaic lowering, so the acos + mean
    # epilogue stays in plain JAX (one small fused XLA op over ~4*N bytes).
    angle = jnp.arccos(cos_t.reshape(rows * LANE)[:N])
    return jnp.mean(angle)


# ----------------------------- validation helpers -----------------------------

def _reference(ypred, ytrue, eps=EPS):
    """Plain-JAX mirror of the PyTorch forward."""
    tmp = jnp.einsum("nij,nij->n", ypred, ytrue)   # trace(ypred^T @ ytrue)
    angle = jnp.arccos(jnp.clip((tmp - 1.0) / 2.0, -1.0 + eps, 1.0 - eps))
    return jnp.mean(angle)


def _rotations(axis, angle):
    """Rodrigues formula: unit axes (n, 3), angles (n,) -> rotation matrices."""
    x, y, z = axis[:, 0], axis[:, 1], axis[:, 2]
    zero = jnp.zeros_like(x)
    K = jnp.stack([zero, -z, y, z, zero, -x, -y, x, zero], axis=1).reshape(-1, 3, 3)
    eye = jnp.eye(3, dtype=jnp.float32)
    s = jnp.sin(angle)[:, None, None]
    c1 = (1.0 - jnp.cos(angle))[:, None, None]
    return eye + s * K + c1 * jnp.matmul(K, K)


def _random_unit(key, n):
    v = jax.random.normal(key, (n, 3), dtype=jnp.float32)
    return v / jnp.linalg.norm(v, axis=1, keepdims=True)


def _make_pair(key, n):
    """(ypred, ytrue) with relative angles in [0.25, 2.85] so acos is well-conditioned."""
    k1, k2, k3, k4 = jax.random.split(key, 4)
    ypred = _rotations(_random_unit(k1, n),
                       jax.random.uniform(k2, (n,), minval=0.0, maxval=float(np.pi)))
    delta = _rotations(_random_unit(k3, n),
                       jax.random.uniform(k4, (n,), minval=0.25, maxval=2.85))
    return ypred, jnp.matmul(ypred, delta)


if __name__ == "__main__":
    key = jax.random.PRNGKey(0)
    ka, kb, kc = jax.random.split(key, 3)

    # 1) Batch that is a multiple of 128: zero-copy lane-dense fast path.
    yp1, yt1 = _make_pair(ka, 1024)
    loss1 = jax.block_until_ready(geodesic_loss_forward(yp1, yt1))
    ref1 = jax.block_until_ready(_reference(yp1, yt1))
    np.testing.assert_allclose(np.asarray(loss1), np.asarray(ref1), atol=2e-4, rtol=2e-4)

    # 2) Batch that is NOT a multiple of 128: exercises the small pad + [:N] mask.
    yp2, yt2 = _make_pair(kb, 1000)
    loss2 = jax.block_until_ready(geodesic_loss_forward(yp2, yt2))
    ref2 = jax.block_until_ready(_reference(yp2, yt2))
    np.testing.assert_allclose(np.asarray(loss2), np.asarray(ref2), atol=2e-4, rtol=2e-4)

    # 3) Batch large enough for a 2-step grid with a partial last block
    #    (exercises the pipelined / resident-R path used at production sizes).
    yp3, yt3 = _make_pair(kc, 33000)
    loss3 = jax.block_until_ready(geodesic_loss_forward(yp3, yt3))
    ref3 = jax.block_until_ready(_reference(yp3, yt3))
    np.testing.assert_allclose(np.asarray(loss3), np.asarray(ref3), atol=2e-4, rtol=2e-4)

    assert loss1.shape == () and loss2.shape == () and loss3.shape == ()
    print("KERNEL_OK")
</pallas_src>

<mosaic_0001>
module attributes {stable_mosaic.version = 11 : i64} {
  func.func @_geodesic_kernel(%arg0: i32, %arg1: memref<1152x128xbf16, #tpu.memory_space<vmem>>, %arg2: memref<8x1152xf32, #tpu.memory_space<vmem>>, %arg3: memref<8x1152xf32, #tpu.memory_space<vmem>>, %arg4: memref<8x128xf32, #tpu.memory_space<vmem>>) attributes {dimension_semantics = [#tpu.dimension_semantics<parallel>], iteration_bounds = array<i64: 1>, scalar_prefetch = 0 : i64, scratch_operands = 0 : i64, tpu.core_type = #tpu.core_type<tc>, window_params = [{pipeline_mode = #tpu.pipeline_mode<synchronous>, transform_indices = @transform_0, window_bounds = array<i64: 1152, 128>}, {transform_indices = @transform_1, window_bounds = array<i64: 8, 1152>}, {transform_indices = @transform_2, window_bounds = array<i64: 8, 1152>}, {transform_indices = @transform_3, window_bounds = array<i64: 8, 128>}]} {
    %c0 = arith.constant 0 : index
    %c0_0 = arith.constant 0 : index
    %0 = vector.load %arg2[%c0, %c0_0] : memref<8x1152xf32, #tpu.memory_space<vmem>>, vector<8x1152xf32>
    %c0_1 = arith.constant 0 : index
    %c0_2 = arith.constant 0 : index
    %1 = vector.load %arg3[%c0_1, %c0_2] : memref<8x1152xf32, #tpu.memory_space<vmem>>, vector<8x1152xf32>
    %2 = arith.mulf %0, %1 : vector<8x1152xf32>
    %3 = arith.truncf %2 : vector<8x1152xf32> to vector<8x1152xbf16>
    %4 = arith.extf %3 : vector<8x1152xbf16> to vector<8x1152xf32>
    %5 = arith.subf %2, %4 : vector<8x1152xf32>
    %6 = arith.truncf %5 : vector<8x1152xf32> to vector<8x1152xbf16>
    %c0_3 = arith.constant 0 : index
    %c0_4 = arith.constant 0 : index
    %7 = vector.load %arg1[%c0_3, %c0_4] : memref<1152x128xbf16, #tpu.memory_space<vmem>>, vector<1152x128xbf16>
    %cst = arith.constant dense<0.000000e+00> : vector<8x128xf32>
    %8 = tpu.matmul %3, %7, %cst {dimension_numbers = #tpu.dot_dimension_numbers<[1], [0], [0], [1], [0, 0, 1, 1], [], []>} : vector<8x1152xbf16>, vector<1152x128xbf16>, vector<8x128xf32> -> vector<8x128xf32>
    %cst_5 = arith.constant dense<0.000000e+00> : vector<8x128xf32>
    %9 = tpu.matmul %6, %7, %cst_5 {dimension_numbers = #tpu.dot_dimension_numbers<[1], [0], [0], [1], [0, 0, 1, 1], [], []>} : vector<8x1152xbf16>, vector<1152x128xbf16>, vector<8x128xf32> -> vector<8x128xf32>
    %10 = arith.addf %8, %9 : vector<8x128xf32>
    %cst_6 = arith.constant 1.000000e+00 : f32
    %11 = vector.broadcast %cst_6 : f32 to vector<8x128xf32>
    %12 = arith.subf %10, %11 : vector<8x128xf32>
    %cst_7 = arith.constant 5.000000e-01 : f32
    %13 = vector.broadcast %cst_7 : f32 to vector<8x128xf32>
    %14 = arith.mulf %12, %13 : vector<8x128xf32>
    %cst_8 = arith.constant -0.99999988 : f32
    %cst_9 = arith.constant 0.99999988 : f32
    %15 = vector.broadcast %cst_8 : f32 to vector<8x128xf32>
    %16 = arith.maximumf %15, %14 : vector<8x128xf32>
    %17 = vector.broadcast %cst_9 : f32 to vector<8x128xf32>
    %18 = arith.minimumf %17, %16 : vector<8x128xf32>
    %c0_10 = arith.constant 0 : index
    %c0_11 = arith.constant 0 : index
    %19 = vector.load %arg4[%c0_10, %c0_11] : memref<8x128xf32, #tpu.memory_space<vmem>>, vector<8x128xf32>
    tpu.vector_store %arg4[%c0_10, %c0_11], %18 {strides = array<i32>} : memref<8x128xf32, #tpu.memory_space<vmem>>, vector<8x128xf32>,
    return
  }
  func.func @transform_0(%arg0: i32) -> (i32, i32) {
    %c0_i32 = arith.constant 0 : i32
    %c0_i32_0 = arith.constant 0 : i32
    %c0_i32_1 = arith.constant 0 : i32
    return %c0_i32, %c0_i32_0 : i32, i32
  }
  func.func @transform_1(%arg0: i32) -> (i32, i32) {
    %c0_i32 = arith.constant 0 : i32
    %c0_i32_0 = arith.constant 0 : i32
    return %arg0, %c0_i32 : i32, i32
  }
  func.func @transform_2(%arg0: i32) -> (i32, i32) {
    %c0_i32 = arith.constant 0 : i32
    %c0_i32_0 = arith.constant 0 : i32
    return %arg0, %c0_i32 : i32, i32
  }
  func.func @transform_3(%arg0: i32) -> (i32, i32) {
    %c0_i32 = arith.constant 0 : i32
    %c0_i32_0 = arith.constant 0 : i32
    return %arg0, %c0_i32 : i32, i32
  }
}

</mosaic_0001>

<bundles_post_ra>
// kernel: geodesic_loss_forward.1
= control target key start
LH: loop header
LB: loop body
LE: loop exit
PB: predicated region body
PF: predicated region fallthrough
CT: control target
= control target key end

     0   :  { %s1895_s0 = inlined_call_operand.vmem [shape: bf16[1152,128], index: 0, kind: input, shape index: {}]   ;;  %s1896_s1 = inlined_call_operand.vmem [shape: f32[8,1152], index: 1, kind: input, shape index: {}]   ;;  %s1897_s2 = inlined_call_operand.vmem [shape: f32[8,1152], index: 2, kind: input, shape index: {}]   ;;  %s1898_s3 = inlined_call_operand.vmem [shape: f32[8,128], index: 3, kind: output, shape index: {}]  }
   0x1   :  { %v1309_v0 = vld [vmem:[%s1895_s0 + $0x38] sm:$0xff]  ;;  %v1331_v4 = vld [vmem:[%s1895_s0 + $0x30] sm:$0xff]  ;;  %v1355_v8 = vld [vmem:[%s1895_s0 + $0x28] sm:$0xff] }
   0x2   :  { %v1314_v1 = vld [vmem:[%s1895_s0 + $0x78] sm:$0xff]  ;;  %649 = vmatpush.bf16.msra.mxu0 %v1309_v0  ;;  %v1336_v5 = vld [vmem:[%s1895_s0 + $0x70] sm:$0xff]  ;;  %v1360_v9 = vld [vmem:[%s1895_s0 + $0x68] sm:$0xff] }
   0x3   :  { %v1319_v2 = vld [vmem:[%s1895_s0 + $0xb8] sm:$0xff]  ;;  %662 = vmatpush.bf16.msra.mxu1 %v1314_v1  ;;  %v1343_v6 = vld [vmem:[%s1895_s0 + $0xb0] sm:$0xff]  ;;  %v1367_v10 = vld [vmem:[%s1895_s0 + $0xa8] sm:$0xff] }
   0x4   :  { %v1324_v3 = vld [vmem:[%s1895_s0 + $0xf8] sm:$0xff]  ;;  %675 = vmatpush.bf16.msra.mxu2 %v1319_v2  ;;  %v1348_v7 = vld [vmem:[%s1895_s0 + $0xf0] sm:$0xff]  ;;  %v1372_v11 = vld [vmem:[%s1895_s0 + $0xe8] sm:$0xff] }
   0x5   :  { %688 = vmatpush.bf16.msra.mxu3 %v1324_v3  ;;  %v1379_v12 = vld [vmem:[%s1895_s0 + $0x20] sm:$0xff]  ;;  %v1403_v16 = vld [vmem:[%s1895_s0 + $0x18] sm:$0xff]  ;;  %v1425_v20 = vld [vmem:[%s1895_s0 + $0x10] sm:$0xff] }
   0x6   :  { %650 = vmatpush.bf16.msra.mxu0 %v1331_v4  ;;  %v1384_v13 = vld [vmem:[%s1895_s0 + $0x60] sm:$0xff]  ;;  %v1408_v17 = vld [vmem:[%s1895_s0 + $0x58] sm:$0xff]  ;;  %v1430_v21 = vld [vmem:[%s1895_s0 + $0x50] sm:$0xff] }
   0x7   :  { %663 = vmatpush.bf16.msra.mxu1 %v1336_v5  ;;  %v1391_v14 = vld [vmem:[%s1895_s0 + $0xa0] sm:$0xff]  ;;  %v1415_v18 = vld [vmem:[%s1895_s0 + $0x98] sm:$0xff]  ;;  %v1435_v22 = vld [vmem:[%s1895_s0 + $0x90] sm:$0xff] }
   0x8   :  { %676 = vmatpush.bf16.msra.mxu2 %v1343_v6  ;;  %v1396_v15 = vld [vmem:[%s1895_s0 + $0xe0] sm:$0xff]  ;;  %v1420_v19 = vld [vmem:[%s1895_s0 + $0xd8] sm:$0xff]  ;;  %v16_v23 = vld [vmem:[%s1896_s1 + $0x10] sm:$0xff] }
   0x9   :  { %689 = vmatpush.bf16.msra.mxu3 %v1348_v7  ;;  %v17_v24 = vld [vmem:[%s1896_s1 + $0x18] sm:$0xff]  ;;  %v25_v25 = vld [vmem:[%s1897_s2 + $0x10] sm:$0xff]  ;;  %v14_v29 = vld [vmem:[%s1896_s1] sm:$0xff] }
   0xa   :  { %651 = vmatpush.bf16.msra.mxu0 %v1355_v8  ;;  %v1451_v26 = vld [vmem:[%s1895_s0 + $0xd0] sm:$0xff]  ;;  %v26_v27 = vld [vmem:[%s1897_s2 + $0x18] sm:$0xff]  ;;  %v34_v28 = vmul.f32 %v25_v25, %v16_v23  ;;  %v15_v31 = vld [vmem:[%s1896_s1 + $0x8] sm:$0xff] }
   0xb   :  { %664 = vmatpush.bf16.msra.mxu1 %v1360_v9  ;;  %v35_v30 = vmul.f32 %v26_v27, %v17_v24  ;;  %v23_v32 = vld [vmem:[%s1897_s2] sm:$0xff]  ;;  %v24_v33 = vld [vmem:[%s1897_s2 + $0x8] sm:$0xff]  ;;  %v1524_v51 = vld [vmem:[%s1895_s0 + $0x138] sm:$0xff] }
   0xc   :  { %677 = vmatpush.bf16.msra.mxu2 %v1367_v10  ;;  %v32_v34 = vmul.f32 %v23_v32, %v14_v29  ;;  %v33_v35 = vmul.f32 %v24_v33, %v15_v31  ;;  %v1477_v37 = vld [vmem:[%s1895_s0 + $0x8] sm:$0xff]  ;;  %v1507_v46 = vld [vmem:[%s1895_s0] sm:$0xff]  ;;  %v1529_v53 = vld [vmem:[%s1895_s0 + $0x178] sm:$0xff] }
   0xd   :  { %690 = vmatpush.bf16.msra.mxu3 %v1372_v11  ;;  %v1470_v36 = vpack.c.bf16 %v35_v30, %v34_v28  ;;  %v1482_v38 = vld [vmem:[%s1895_s0 + $0x48] sm:$0xff]  ;;  %v1512_v47 = vld [vmem:[%s1895_s0 + $0x40] sm:$0xff]  ;;  %v1534_v54 = vld [vmem:[%s1895_s0 + $0x1b8] sm:$0xff] }
   0xe   :  { %652 = vmatpush.bf16.msra.mxu0 %v1379_v12  ;;  %v1484_v39 = vpack.c.bf16 %v33_v35, %v32_v34  ;;  %v1491_v40 = vld [vmem:[%s1895_s0 + $0x88] sm:$0xff]  ;;  %v1519_v50 = vld [vmem:[%s1895_s0 + $0x80] sm:$0xff]  ;;  %v1546_v58 = vld [vmem:[%s1895_s0 + $0x1f8] sm:$0xff] }
   0xf   :  { %665 = vmatpush.bf16.msra.mxu1 %v1384_v13  ;;  %v1496_v41 = vld [vmem:[%s1895_s0 + $0xc8] sm:$0xff]  ;;  %v48_v42 = vunpack.c.l.bf16 %v1470_v36  ;;  %v49_v45 = vunpack.c.h.bf16 %v1470_v36  ;;  %v1539_v55 = vld [vmem:[%s1895_s0 + $0xc0] sm:$0xff]  ;;  %1919 = vst [vmem:[#allocation4_spill] sm:$0xff] %v1546_v58  ;;  %v1553_v60 = vld [vmem:[%s1895_s0 + $0x130] sm:$0xff] }
  0x10   :  { %678 = vmatpush.bf16.msra.mxu2 %v1391_v14  ;;  %1917 = vst [vmem:[#allocation2_spill] sm:$0xff] %v1496_v41  ;;  %v46_v43 = vunpack.c.l.bf16 %v1484_v39  ;;  %v47_v44 = vunpack.c.h.bf16 %v1484_v39  ;;  %v1560_v62 = vld [vmem:[%s1895_s0 + $0x170] sm:$0xff]  ;;  %v1578_v25 = vld [vmem:[%s1895_s0 + $0x128] sm:$0xff]  ;;  %v1606_v31 = vld [vmem:[%s1895_s0 + $0x160] sm:$0xff] }
  0x11   :  { %691 = vmatpush.bf16.msra.mxu3 %v1396_v15  ;;  %v57_v48 = vsub.f32 %v34_v28, %v48_v42  ;;  %1918 = vst [vmem:[#allocation3_spill] sm:$0xff] %v1539_v55  ;;  %v58_v57 = vsub.f32 %v35_v30, %v49_v45  ;;  %v1565_v63 = vld [vmem:[%s1895_s0 + $0x1b0] sm:$0xff]  ;;  %v1585_v27 = vld [vmem:[%s1895_s0 + $0x168] sm:$0xff]  ;;  %v1601_v30 = vld [vmem:[%s1895_s0 + $0x120] sm:$0xff] }
  0x12   :  { %653 = vmatpush.bf16.msra.mxu0 %v1403_v16  ;;  %v55_v49 = vsub.f32 %v32_v34, %v46_v43  ;;  %v56_v52 = vsub.f32 %v33_v35, %v47_v44  ;;  %v1572_v24 = vld [vmem:[%s1895_s0 + $0x1f0] sm:$0xff]  ;;  %v1590_v28 = vld [vmem:[%s1895_s0 + $0x1a8] sm:$0xff]  ;;  %v1612_v32 = vld [vmem:[%s1895_s0 + $0x1a0] sm:$0xff] }
  0x13   :  { %666 = vmatpush.bf16.msra.mxu1 %v1408_v17  ;;  %v66_v59 = vpack.c.bf16 %v57_v48, %v57_v48  ;;  %v67_v23 = vpack.c.bf16 %v58_v57, %v58_v57  ;;  %1920 = vst [vmem:[#allocation5_spill] sm:$0xff] %v1572_v24  ;;  %v1596_v29 = vld [vmem:[%s1895_s0 + $0x1e8] sm:$0xff]  ;;  %v20_v33 = vld [vmem:[%s1896_s1 + $0x30] sm:$0xff]  ;;  %v21_v34 = vld [vmem:[%s1896_s1 + $0x38] sm:$0xff] }
  0x14   :  { %679 = vmatpush.bf16.msra.mxu2 %v1415_v18  ;;  %v64_v56 = vpack.c.bf16 %v55_v49, %v55_v49  ;;  %v65_v61 = vpack.c.bf16 %v56_v52, %v56_v52  ;;  %1921 = vst [vmem:[#allocation6_spill] sm:$0xff] %v1596_v29  ;;  %v29_v35 = vld [vmem:[%s1897_s2 + $0x30] sm:$0xff]  ;;  %v30_v42 = vld [vmem:[%s1897_s2 + $0x38] sm:$0xff]  ;;  %v18_v43 = vld [vmem:[%s1896_s1 + $0x20] sm:$0xff] }
  0x15   :  { %692 = vmatpush.bf16.msra.mxu3 %v1420_v19  ;;  %v19_v44 = vld [vmem:[%s1896_s1 + $0x28] sm:$0xff]  ;;  %v27_v45 = vld [vmem:[%s1897_s2 + $0x20] sm:$0xff]  ;;  %v1650_v52 = vld [vmem:[%s1895_s0 + $0x118] sm:$0xff]  ;;  %v39_v57 = vmul.f32 %v30_v42, %v21_v34 }
  0x16   :  { %654 = vmatpush.bf16.msra.mxu0 %v1425_v20  ;;  %v28_v48 = vld [vmem:[%s1897_s2 + $0x28] sm:$0xff]  ;;  %v1644_v49 = vld [vmem:[%s1895_s0 + $0x1e0] sm:$0xff]  ;;  %v1674_v34 = vld [vmem:[%s1895_s0 + $0x110] sm:$0xff] }
  0x17   :  { %667 = vmatpush.bf16.msra.mxu1 %v1430_v21  ;;  %1922 = vst [vmem:[#allocation7_spill] sm:$0xff] %v1644_v49  ;;  %v1683_v42 = vld [vmem:[%s1895_s0 + $0x150] sm:$0xff] }
  0x18   :  { %680 = vmatpush.bf16.msra.mxu2 %v1435_v22  ;;  %1924 = vst [vmem:[#allocation9_spill] sm:$0xff] %v1674_v34 }
  0x19   :  { %693 = vmatpush.bf16.msra.mxu3 %v1451_v26  ;;  %1926 = vst [vmem:[#allocation11_spill] sm:$0xff] %v1683_v42 }
  0x1a   :  { %655 = vmatpush.bf16.msra.mxu0 %v1477_v37 }
  0x1b   :  { %668 = vmatpush.bf16.msra.mxu1 %v1482_v38 }
  0x1c   :  { %681 = vmatpush.bf16.msra.mxu2 %v1491_v40 }
  0x1d   :  { %694 = vmatpush.bf16.msra.mxu3 %v1496_v41  ;;  %v1723_v41 = vld [vmem:[%s1895_s0 + $0x1c8] sm:$0xff] }
  0x1e   :  { %656 = vmatpush.bf16.msra.mxu0 %v1507_v46 }
  0x1f   :  { %669 = vmatpush.bf16.msra.mxu1 %v1512_v47 }
  0x20   :  { %682 = vmatpush.bf16.msra.mxu2 %v1519_v50 }
  0x21   :  { %695 = vmatpush.bf16.msra.mxu3 %v1539_v55  ;;  %657 = vmatmul.bf16.vlgmr.msra.gmra.mxu0 %v64_v56  ;;  %v38_v56 = vmul.f32 %v29_v35, %v20_v33  ;;  %v1668_v33 = vld [vmem:[%s1895_s0 + $0x1d8] sm:$0xff] }
  0x22   :  { %701 = vmatpush.bf16.msrb.mxu0 %v1524_v51  ;;  %670 = vmatmul.bf16.vlgmr.msra.gmra.mxu1 %v65_v61  ;;  %v1662_v61 = vld [vmem:[%s1895_s0 + $0x198] sm:$0xff]  ;;  %1923 = vst [vmem:[#allocation8_spill] sm:$0xff] %v1668_v33 }
  0x23   :  { %714 = vmatpush.bf16.msrb.mxu1 %v1529_v53  ;;  %683 = vmatmul.bf16.vlgmr.msra.gmra.mxu2 %v66_v59  ;;  %v1657_v59 = vld [vmem:[%s1895_s0 + $0x158] sm:$0xff]  ;;  %v1676_v35 = vpack.c.bf16 %v39_v57, %v38_v56 }
  0x24   :  { %727 = vmatpush.bf16.msrb.mxu2 %v1534_v54  ;;  %696 = vmatmul.bf16.vlgmr.msra.gmra.mxu3 %v67_v23  ;;  %v36_v23 = vmul.f32 %v27_v45, %v18_v43  ;;  %v1688_v43 = vld [vmem:[%s1895_s0 + $0x190] sm:$0xff] }
  0x25   :  { %740 = vmatpush.bf16.msrb.mxu3 %v1546_v58  ;;  %1925 = vst [vmem:[#allocation10_spill] sm:$0xff] %v1676_v35  ;;  %v1696_v45 = vld [vmem:[%s1895_s0 + $0x1d0] sm:$0xff] }
  0x26   :  { %702 = vmatpush.bf16.msrb.mxu0 %v1553_v60  ;;  %1927 = vst [vmem:[#allocation12_spill] sm:$0xff] %v1688_v43 }
  0x27   :  { %715 = vmatpush.bf16.msrb.mxu1 %v1560_v62  ;;  %1929 = vst [vmem:[#allocation14_spill] sm:$0xff] %v1696_v45 }
  0x28   :  { %728 = vmatpush.bf16.msrb.mxu2 %v1565_v63 }
  0x29   :  { %741 = vmatpush.bf16.msrb.mxu3 %v1572_v24  ;;  %v1715_v24 = vld [vmem:[%s1895_s0 + $0x188] sm:$0xff] }
  0x2a   :  { %703 = vmatpush.bf16.msrb.mxu0 %v1578_v25  ;;  %1932 = vst [vmem:[#allocation17_spill] sm:$0xff] %v1715_v24 }
  0x2b   :  { %716 = vmatpush.bf16.msrb.mxu1 %v1585_v27 }
  0x2c   :  { %729 = vmatpush.bf16.msrb.mxu2 %v1590_v28 }
  0x2d   :  { %742 = vmatpush.bf16.msrb.mxu3 %v1596_v29  ;;  %v37_v29 = vmul.f32 %v28_v48, %v19_v44  ;;  %v1702_v48 = vld [vmem:[%s1895_s0 + $0x108] sm:$0xff] }
  0x2e   :  { %704 = vmatpush.bf16.msrb.mxu0 %v1601_v30  ;;  %1930 = vst [vmem:[#allocation15_spill] sm:$0xff] %v1702_v48 }
  0x2f   :  { %717 = vmatpush.bf16.msrb.mxu1 %v1606_v31  ;;  %v1690_v44 = vpack.c.bf16 %v37_v29, %v36_v23 }
  0x30   :  { %730 = vmatpush.bf16.msrb.mxu2 %v1612_v32 }
  0x31   :  { %743 = vmatpush.bf16.msrb.mxu3 %v1644_v49  ;;  %1928 = vst [vmem:[#allocation13_spill] sm:$0xff] %v1690_v44  ;;  %v52_v49 = vunpack.c.l.bf16 %v1676_v35  ;;  %v50_v58 = vunpack.c.l.bf16 %v1690_v44  ;;  %v51_v55 = vunpack.c.h.bf16 %v1690_v44 }
  0x32   :  { %705 = vmatpush.bf16.msrb.mxu0 %v1650_v52 }
  0x33   :  { %718 = vmatpush.bf16.msrb.mxu1 %v1657_v59  ;;  %v60_v44 = vsub.f32 %v37_v29, %v51_v55  ;;  %v1763_v29 = vld [vmem:[%s1895_s0 + $0x230] sm:$0xff] }
  0x34   :  { %731 = vmatpush.bf16.msrb.mxu2 %v1662_v61 }
  0x35   :  { %744 = vmatpush.bf16.msrb.mxu3 %v1668_v33  ;;  %v1710_v33 = vld [vmem:[%s1895_s0 + $0x148] sm:$0xff] }
  0x36   :  { %706 = vmatpush.bf16.msrb.mxu0 %v1674_v34  ;;  %1931 = vst [vmem:[#allocation16_spill] sm:$0xff] %v1710_v33  ;;  %v61_v34 = vsub.f32 %v38_v56, %v52_v49  ;;  %v1747_v49 = vld [vmem:[%s1895_s0 + $0x238] sm:$0xff]  ;;  %v1753_v56 = vld [vmem:[%s1895_s0 + $0x1c0] sm:$0xff] }
  0x37   :  { %719 = vmatpush.bf16.msrb.mxu1 %v1683_v42  ;;  %v1730_v42 = vld [vmem:[%s1895_s0 + $0x100] sm:$0xff] }
  0x38   :  { %732 = vmatpush.bf16.msrb.mxu2 %v1688_v43  ;;  %v53_v43 = vunpack.c.h.bf16 %v1676_v35  ;;  %v1742_v35 = vld [vmem:[%s1895_s0 + $0x180] sm:$0xff] }
  0x39   :  { %745 = vmatpush.bf16.msrb.mxu3 %v1696_v45  ;;  %v1737_v45 = vld [vmem:[%s1895_s0 + $0x140] sm:$0xff] }
  0x3a   :  { %707 = vmatpush.bf16.msrb.mxu0 %v1702_v48  ;;  %v59_v48 = vsub.f32 %v36_v23, %v50_v58  ;;  %v69_v58 = vpack.c.bf16 %v60_v44, %v60_v44 }
  0x3b   :  { %720 = vmatpush.bf16.msrb.mxu1 %v1710_v33  ;;  %v70_v33 = vpack.c.bf16 %v61_v34, %v61_v34 }
  0x3c   :  { %733 = vmatpush.bf16.msrb.mxu2 %v1715_v24  ;;  %v62_v24 = vsub.f32 %v39_v57, %v53_v43  ;;  %v68_v55 = vpack.c.bf16 %v59_v48, %v59_v48 }
  0x3d   :  { %746 = vmatpush.bf16.msrb.mxu3 %v1723_v41 }
  0x3e   :  { %708 = vmatpush.bf16.msrb.mxu0 %v1730_v42  ;;  %v71_v57 = vpack.c.bf16 %v62_v24, %v62_v24  ;;  %v1944_v24 = vld [vmem:[#allocation5_spill] sm:$0xff] }
  0x3f   :  { %721 = vmatpush.bf16.msrb.mxu1 %v1737_v45 }
  0x40   :  { %734 = vmatpush.bf16.msrb.mxu2 %v1742_v35 }
  0x41   :  { %747 = vmatpush.bf16.msrb.mxu3 %v1753_v56  ;;  %709 = vmatmul.bf16.vlgmr.msrb.gmra.mxu0 %v68_v55 }
  0x42   :  { %753 = vmatpush.bf16.msra.mxu0 %v1747_v49  ;;  %722 = vmatmul.bf16.vlgmr.msrb.gmra.mxu1 %v69_v58 }
  0x43   :  { %798 = vmatpush.bf16.msra.mxu1 %v1309_v0  ;;  %735 = vmatmul.bf16.vlgmr.msrb.gmra.mxu2 %v70_v33  ;;  %v1773_v0 = vld [vmem:[%s1895_s0 + $0x228] sm:$0xff] }
  0x44   :  { %811 = vmatpush.bf16.msra.mxu2 %v1314_v1  ;;  %748 = vmatmul.bf16.vlgmr.msrb.gmra.mxu3 %v71_v57  ;;  %v1782_v1 = vld [vmem:[%s1895_s0 + $0x220] sm:$0xff] }
  0x45   :  { %824 = vmatpush.bf16.msra.mxu3 %v1319_v2  ;;  %v22_v2 = vld [vmem:[%s1896_s1 + $0x40] sm:$0xff] }
  0x46   :  { %754 = vmatpush.bf16.msra.mxu0 %v1763_v29 }
  0x47   :  { %799 = vmatpush.bf16.msra.mxu1 %v1331_v4  ;;  %v31_v4 = vld [vmem:[%s1897_s2 + $0x40] sm:$0xff] }
  0x48   :  { %812 = vmatpush.bf16.msra.mxu2 %v1336_v5  ;;  %v40_v5 = vmul.f32 %v31_v4, %v22_v2 }
  0x49   :  { %825 = vmatpush.bf16.msra.mxu3 %v1343_v6  ;;  %v1797_v6 = vld [vmem:[%s1895_s0 + $0x218] sm:$0xff] }
  0x4a   :  { %755 = vmatpush.bf16.msra.mxu0 %v1773_v0 }
  0x4b   :  { %800 = vmatpush.bf16.msra.mxu1 %v1355_v8  ;;  %v1801_v8 = vpack.c.bf16 %v40_v5, %v40_v5 }
  0x4c   :  { %813 = vmatpush.bf16.msra.mxu2 %v1360_v9  ;;  %v1808_v9 = vld [vmem:[%s1895_s0 + $0x210] sm:$0xff] }
  0x4d   :  { %826 = vmatpush.bf16.msra.mxu3 %v1367_v10  ;;  %v54_v10 = vunpack.c.l.bf16 %v1801_v8 }
  0x4e   :  { %756 = vmatpush.bf16.msra.mxu0 %v1782_v1 }
  0x4f   :  { %801 = vmatpush.bf16.msra.mxu1 %v1379_v12  ;;  %v1818_v12 = vld [vmem:[%s1895_s0 + $0x208] sm:$0xff] }
  0x50   :  { %814 = vmatpush.bf16.msra.mxu2 %v1384_v13  ;;  %v63_v13 = vsub.f32 %v40_v5, %v54_v10 }
  0x51   :  { %827 = vmatpush.bf16.msra.mxu3 %v1391_v14  ;;  %v1827_v14 = vld [vmem:[%s1895_s0 + $0x200] sm:$0xff] }
  0x52   :  { %757 = vmatpush.bf16.msra.mxu0 %v1797_v6 }
  0x53   :  { %802 = vmatpush.bf16.msra.mxu1 %v1403_v16  ;;  %v772_v16 = vunpack.c.h.b16 %v1484_v39 }
  0x54   :  { %815 = vmatpush.bf16.msra.mxu2 %v1408_v17  ;;  %v771_v17 = vunpack.c.l.b16 %v1484_v39  ;;  %v1937_v39 = vld [vmem:[#allocation13_spill] sm:$0xff] }
  0x55   :  { %828 = vmatpush.bf16.msra.mxu3 %v1415_v18  ;;  %v773_v18 = vunpack.c.l.b16 %v1470_v36 }
  0x56   :  { %758 = vmatpush.bf16.msra.mxu0 %v1808_v9 }
  0x57   :  { %803 = vmatpush.bf16.msra.mxu1 %v1425_v20  ;;  %v72_v20 = vpack.c.bf16 %v63_v13, %v63_v13 }
  0x58   :  { %816 = vmatpush.bf16.msra.mxu2 %v1430_v21  ;;  %v781_v21 = vpack.c.b16 %v772_v16, %v772_v16 }
  0x59   :  { %829 = vmatpush.bf16.msra.mxu3 %v1435_v22  ;;  %v780_v22 = vpack.c.b16 %v771_v17, %v771_v17 }
  0x5a   :  { %759 = vmatpush.bf16.msra.mxu0 %v1818_v12 }
  0x5b   :  { %804 = vmatpush.bf16.msra.mxu1 %v1477_v37  ;;  %v782_v37 = vpack.c.b16 %v773_v18, %v773_v18 }
  0x5c   :  { %817 = vmatpush.bf16.msra.mxu2 %v1482_v38  ;;  %v1936_v38 = vld [vmem:[#allocation2_spill] sm:$0xff] }
  0x5d   :  { %830 = vmatpush.bf16.msra.mxu3 %v1491_v40  ;;  %v1938_v40 = vld [vmem:[#allocation15_spill] sm:$0xff] }
  0x5e   :  { %760 = vmatpush.bf16.msra.mxu0 %v1827_v14 }
  0x5f   :  { %805 = vmatpush.bf16.msra.mxu1 %v1507_v46  ;;  %v776_v46 = vunpack.c.h.b16 %v1937_v39 }
  0x60   :  { %818 = vmatpush.bf16.msra.mxu2 %v1512_v47  ;;  %v1939_v47 = vld [vmem:[#allocation16_spill] sm:$0xff] }
  0x61   :  { %831 = vmatpush.bf16.msra.mxu3 %v1519_v50  ;;  %761 = vmatmul.bf16.vlgmr.msra.gmra.mxu0 %v72_v20  ;;  %v1940_v50 = vld [vmem:[#allocation10_spill] sm:$0xff] }
  0x62   :  { %837 = vmatpush.bf16.msrb.mxu0 %v1324_v3  ;;  %806 = vmatmul.bf16.vlgmr.msra.gmra.mxu1 %v780_v22  ;;  %v1933_v3 = vld [vmem:[#allocation9_spill] sm:$0xff] }
  0x63   :  { %850 = vmatpush.bf16.msrb.mxu1 %v1524_v51  ;;  %819 = vmatmul.bf16.vlgmr.msra.gmra.mxu2 %v781_v21  ;;  %v1941_v51 = vld [vmem:[#allocation17_spill] sm:$0xff] }
  0x64   :  { %863 = vmatpush.bf16.msrb.mxu2 %v1529_v53  ;;  %832 = vmatmul.bf16.vlgmr.msra.gmra.mxu3 %v782_v37 }
  0x65   :  { %876 = vmatpush.bf16.msrb.mxu3 %v1534_v54  ;;  %v1942_v54 = vld [vmem:[#allocation3_spill] sm:$0xff] }
  0x66   :  { %838 = vmatpush.bf16.msrb.mxu0 %v1348_v7  ;;  %v1934_v7 = vld [vmem:[#allocation11_spill] sm:$0xff] }
  0x67   :  { %851 = vmatpush.bf16.msrb.mxu1 %v1553_v60 }
  0x68   :  { %864 = vmatpush.bf16.msrb.mxu2 %v1560_v62  ;;  %v785_v62 = vpack.c.b16 %v776_v46, %v776_v46 }
  0x69   :  { %877 = vmatpush.bf16.msrb.mxu3 %v1565_v63 }
  0x6a   :  { %839 = vmatpush.bf16.msrb.mxu0 %v1372_v11  ;;  %v1935_v11 = vld [vmem:[#allocation12_spill] sm:$0xff] }
  0x6b   :  { %852 = vmatpush.bf16.msrb.mxu1 %v1578_v25  ;;  %v1945_v25 = vld [vmem:[#allocation6_spill] sm:$0xff] }
  0x6c   :  { %865 = vmatpush.bf16.msrb.mxu2 %v1585_v27  ;;  %v1946_v27 = vld [vmem:[#allocation7_spill] sm:$0xff] }
  0x6d   :  { %878 = vmatpush.bf16.msrb.mxu3 %v1590_v28  ;;  %v1947_v28 = vld [vmem:[#allocation8_spill] sm:$0xff] }
  0x6e   :  { %840 = vmatpush.bf16.msrb.mxu0 %v1396_v15  ;;  %v774_v15 = vunpack.c.h.b16 %v1470_v36  ;;  %v1943_v36 = vld [vmem:[#allocation4_spill] sm:$0xff] }
  0x6f   :  { %853 = vmatpush.bf16.msrb.mxu1 %v1601_v30  ;;  %v1948_v30 = vld [vmem:[#allocation14_spill] sm:$0xff] }
  0x70   :  { %866 = vmatpush.bf16.msrb.mxu2 %v1606_v31  ;;  %v783_v53 = vpack.c.b16 %v774_v15, %v774_v15  ;;  %v778_v31 = vunpack.c.h.b16 %v1940_v50 }
  0x71   :  { %879 = vmatpush.bf16.msrb.mxu3 %v1612_v32  ;;  %v779_v32 = vunpack.c.l.b16 %v1801_v8 }
  0x72   :  { %841 = vmatpush.bf16.msrb.mxu0 %v1420_v19  ;;  %v775_v19 = vunpack.c.l.b16 %v1937_v39 }
  0x73   :  { %854 = vmatpush.bf16.msrb.mxu1 %v1650_v52  ;;  %v787_v52 = vpack.c.b16 %v778_v31, %v778_v31 }
  0x74   :  { %867 = vmatpush.bf16.msrb.mxu2 %v1657_v59  ;;  %v784_v60 = vpack.c.b16 %v775_v19, %v775_v19  ;;  %v788_v59 = vpack.c.b16 %v779_v32, %v779_v32 }
  0x75   :  { %880 = vmatpush.bf16.msrb.mxu3 %v1662_v61 }
  0x76   :  { %842 = vmatpush.bf16.msrb.mxu0 %v1451_v26  ;;  %v777_v26 = vunpack.c.l.b16 %v1940_v50 }
  0x77   :  { %855 = vmatpush.bf16.msrb.mxu1 %v1933_v3 }
  0x78   :  { %868 = vmatpush.bf16.msrb.mxu2 %v1934_v7  ;;  %v786_v63 = vpack.c.b16 %v777_v26, %v777_v26 }
  0x79   :  { %881 = vmatpush.bf16.msrb.mxu3 %v1935_v11 }
  0x7a   :  { %843 = vmatpush.bf16.msrb.mxu0 %v1936_v38 }
  0x7b   :  { %856 = vmatpush.bf16.msrb.mxu1 %v1938_v40 }
  0x7c   :  { %869 = vmatpush.bf16.msrb.mxu2 %v1939_v47 }
  0x7d   :  { %882 = vmatpush.bf16.msrb.mxu3 %v1941_v51 }
  0x7e   :  { %844 = vmatpush.bf16.msrb.mxu0 %v1942_v54 }
  0x7f   :  { %857 = vmatpush.bf16.msrb.mxu1 %v1730_v42 }
  0x80   :  { %870 = vmatpush.bf16.msrb.mxu2 %v1737_v45 }
  0x81   :  { %883 = vmatpush.bf16.msrb.mxu3 %v1742_v35  ;;  %845 = vmatmul.bf16.vlgmr.msrb.gmra.mxu0 %v783_v53 }
  0x82   :  { %889 = vmatpush.bf16.msra.mxu0 %v1943_v36  ;;  %858 = vmatmul.bf16.vlgmr.msrb.gmra.mxu1 %v784_v60 }
  0x83   :  { %902 = vmatpush.bf16.msra.mxu1 %v1747_v49  ;;  %871 = vmatmul.bf16.vlgmr.msrb.gmra.mxu2 %v785_v62 }
  0x84   :  { %884 = vmatmul.bf16.vlgmr.msrb.gmra.mxu3 %v786_v63 }
  0x86   :  { %890 = vmatpush.bf16.msra.mxu0 %v1944_v24 }
  0x87   :  { %903 = vmatpush.bf16.msra.mxu1 %v1763_v29 }
  0x8a   :  { %891 = vmatpush.bf16.msra.mxu0 %v1945_v25 }
  0x8b   :  { %904 = vmatpush.bf16.msra.mxu1 %v1773_v0 }
  0x8e   :  { %892 = vmatpush.bf16.msra.mxu0 %v1946_v27 }
  0x8f   :  { %905 = vmatpush.bf16.msra.mxu1 %v1782_v1 }
  0x92   :  { %893 = vmatpush.bf16.msra.mxu0 %v1947_v28 }
  0x93   :  { %906 = vmatpush.bf16.msra.mxu1 %v1797_v6 }
  0x96   :  { %894 = vmatpush.bf16.msra.mxu0 %v1948_v30 }
  0x97   :  { %907 = vmatpush.bf16.msra.mxu1 %v1808_v9 }
  0x9a   :  { %895 = vmatpush.bf16.msra.mxu0 %v1723_v41 }
  0x9b   :  { %908 = vmatpush.bf16.msra.mxu1 %v1818_v12 }
  0x9e   :  { %896 = vmatpush.bf16.msra.mxu0 %v1753_v56  ;;  %v658_v61 = vpop.f32.mrf.mxu0 }
  0x9f   :  { %909 = vmatpush.bf16.msra.mxu1 %v1827_v14  ;;  %v671_v23 = vpop.f32.mrf.mxu1 }
  0xa0   :  { %v672_v33 = vadd.f32 %v671_v23, %v658_v61 }
  0xa1   :  { %897 = vmatmul.bf16.vlgmr.msra.gmra.mxu0 %v787_v52 }
  0xa2   :  { %910 = vmatmul.bf16.vlgmr.msra.gmra.mxu1 %v788_v59 }
  0xa6   :  { %v684_v34 = vpop.f32.mrf.mxu2  ;;  %v660_v42 = vpop.f32.mrf.mxu0 }
  0xa7   :  { %v685_v35 = vadd.f32 %v684_v34, %v672_v33  ;;  %v697_v43 = vpop.f32.mrf.mxu3  ;;  %v673_v41 = vpop.f32.mrf.mxu1 }
  0xa9   :  { %v698_v44 = vadd.f32 %v697_v43, %v685_v35 }
  0xae   :  { %v686_v45 = vpop.f32.mrf.mxu2 }
  0xaf   :  { %v699_v48 = vpop.f32.mrf.mxu3 }
  0xbe   :  { %v710_v49 = vpop.f32.mrf.mxu0 }
  0xbf   :  { %v723_v55 = vpop.f32.mrf.mxu1  ;;  %v711_v13 = vadd.f32 %v710_v49, %v698_v44 }
  0xc1   :  { %v724_v14 = vadd.f32 %v723_v55, %v711_v13 }
  0xc6   :  { %v736_v58 = vpop.f32.mrf.mxu2  ;;  %v712_v29 = vpop.f32.mrf.mxu0 }
  0xc7   :  { %v749_v56 = vpop.f32.mrf.mxu3  ;;  %v725_v57 = vpop.f32.mrf.mxu1  ;;  %v737_v16 = vadd.f32 %v736_v58, %v724_v14 }
  0xc9   :  { %v750_v20 = vadd.f32 %v749_v56, %v737_v16 }
  0xce   :  { %v738_v0 = vpop.f32.mrf.mxu2 }
  0xcf   :  { %v751_v1 = vpop.f32.mrf.mxu3 }
  0xde   :  { %v762_v2 = vpop.f32.mrf.mxu0 }
  0xdf   :  { %v807_v4 = vpop.f32.mrf.mxu1  ;;  %v763_v21 = vadd.f32 %v762_v2, %v750_v20 }
  0xe1   :  { %v808_v11 = vadd.f32 %v807_v4, %v763_v21 }
  0xe6   :  { %v820_v5 = vpop.f32.mrf.mxu2  ;;  %v764_v6 = vpop.f32.mrf.mxu0 }
  0xe7   :  { %v833_v8 = vpop.f32.mrf.mxu3  ;;  %v809_v9 = vpop.f32.mrf.mxu1  ;;  %v821_v15 = vadd.f32 %v820_v5, %v808_v11 }
  0xe9   :  { %v834_v38 = vadd.f32 %v833_v8, %v821_v15 }
  0xee   :  { %v822_v10 = vpop.f32.mrf.mxu2 }
  0xef   :  { %v835_v12 = vpop.f32.mrf.mxu3 }
  0xfe   :  { %v846_v17 = vpop.f32.mrf.mxu0 }
  0xff   :  { %v859_v18 = vpop.f32.mrf.mxu1  ;;  %v847_v40 = vadd.f32 %v846_v17, %v834_v38 }
 0x101   :  { %v860_v46 = vadd.f32 %v859_v18, %v847_v40 }
 0x106   :  { %v872_v22 = vpop.f32.mrf.mxu2  ;;  %v848_v37 = vpop.f32.mrf.mxu0 }
 0x107   :  { %v885_v3 = vpop.f32.mrf.mxu3  ;;  %v861_v7 = vpop.f32.mrf.mxu1  ;;  %v873_v47 = vadd.f32 %v872_v22, %v860_v46 }
 0x109   :  { %v886_v50 = vadd.f32 %v885_v3, %v873_v47 }
 0x10e   :  { %v874_v39 = vpop.f32.mrf.mxu2 }
 0x10f   :  { %v887_v19 = vpop.f32.mrf.mxu3 }
 0x11e   :  { %v898_v26 = vpop.f32.mrf.mxu0 }
 0x11f   :  { %v899_v51 = vadd.f32 %v898_v26, %v886_v50  ;;  %v911_v53 = vpop.f32.mrf.mxu1 }
 0x121   :  { %v912_v54 = vadd.f32 %v911_v53, %v899_v51 }
 0x123   :  { %v1212_v60 = vadd.f32 -1.0, %v912_v54 }
 0x125   :  { %v916_v36 = vmul.f32 0.5, %v1212_v60 }
 0x126   :  { %v900_v62 = vpop.f32.mrf.mxu0 }
 0x127   :  { %v1213_v63 = vclamps-f32 %v916_v36, 0.9999999  ;;  %v913_v24 = vpop.f32.mrf.mxu1 }
 0x129   :  { %919 = vst [vmem:[%s1898_s3] sm:$0xff] %v1213_v63 }

</bundles_post_ra>
